<compile_context>
chip_gen: v7x
topology: tpu7x:2x2x1
jax: 0.10.0
libtpu: 0.0.40
codegen_flags: <defaults>
</compile_context>

<pallas_src>
import numpy as np
import jax
import jax.numpy as jnp
from jax import lax
from jax.experimental import pallas as pl
from jax.experimental.pallas import tpu as pltpu


_INF = float("inf")          # Python float -> lowered as a literal (no capture)
_SLAB_ROWS = 512             # max adjacency rows touched per partial reduce
_PASSES_PER_CHECK = 4        # relaxation passes per convergence check (large N)
_SMALL_NPAD = 512            # below this: fixed-trip loop, no early-exit scalar


def _make_bf_kernel(n_pad, num_nodes):
    """Kernel for a static padded size and node count."""
    slab = min(_SLAB_ROWS, n_pad)
    n_passes = max(num_nodes - 1, 0)

    def kernel(src_ref, adj_ref, dist_ref):
        # src_ref : SMEM (1,) int32
        # adj_ref : VMEM (n_pad, n_pad) f32 (diag == 0, no-edge / padding == +inf)
        # dist_ref: VMEM (1, n_pad) f32
        src = src_ref[0]

        lane = lax.broadcasted_iota(jnp.int32, (1, n_pad), 1)
        dist0 = jnp.where(lane == src, 0.0, _INF).astype(jnp.float32)

        def relax(dist_row):
            # One Jacobi relaxation: new[d] = min_s(dist[s] + adj[s, d]).
            # Row -> column relayout is O(n_pad); the reduce is a sublane-axis
            # running min over <=slab-row blocks, so the largest temporary is
            # (slab, n_pad) -- never a full n_pad^2 candidate.
            dist_col = dist_row.reshape(n_pad, 1)
            acc = None
            for r0 in range(0, n_pad, slab):
                cand = dist_col[r0:r0 + slab, :] + adj_ref[r0:r0 + slab, :]
                part = jnp.min(cand, axis=0, keepdims=True)
                acc = part if acc is None else jnp.minimum(acc, part)
            return acc

        if n_passes == 0:
            dist_ref[...] = dist0
            return

        if n_pad <= _SMALL_NPAD:
            # Small problem: fixed trip count, zero per-pass scalar round trips.
            if n_passes <= 8:
                dist = lax.fori_loop(0, n_passes, lambda _, d: relax(d), dist0,
                                     unroll=True)
            else:
                dist = lax.fori_loop(0, n_passes, lambda _, d: relax(d), dist0)
        else:
            # Large problem: keep early exit, but amortize the XLU-max ->
            # vreg->sreg -> branch round trip over _PASSES_PER_CHECK passes.
            k = _PASSES_PER_CHECK
            max_outer = pl.cdiv(n_passes, k)

            def body(carry):
                it, d, _ = carry
                new = d
                for _ in range(k):
                    new = relax(new)
                changed = jnp.any(new != d)   # inf != inf is False; NaN-free input
                return it + 1, new, changed

            def cond(carry):
                it, _, changed = carry
                return jnp.logical_and(it < max_outer, changed)

            init = (jnp.zeros((), jnp.int32), dist0, jnp.full((), True))
            _, dist, _ = lax.while_loop(cond, body, init)

        dist_ref[...] = dist

    return kernel


def bellman_ford_pallas(adj_matrix, source_node, num_nodes):
    """Returns the (num_nodes,) shortest-distance vector from source_node."""
    n = int(num_nodes)
    n_pad = max(128, ((n + 127) // 128) * 128)   # lane-dense last dim

    adj = jnp.asarray(adj_matrix, dtype=jnp.float32)
    # Pad with +inf (isolates padded nodes), then force diag -> 0 so the
    # "keep current distance" term folds into the min-plus reduce and the
    # PyTorch `s != d` exclusion is honoured.
    adj_p = jnp.full((n_pad, n_pad), _INF, dtype=jnp.float32)
    adj_p = lax.dynamic_update_slice(adj_p, adj, (0, 0))
    idx = jnp.arange(n_pad)
    adj_p = jnp.where(idx[:, None] == idx[None, :], 0.0, adj_p)

    src = jnp.asarray([source_node], dtype=jnp.int32)
    kernel = _make_bf_kernel(n_pad, n)

    # VMEM budget: single f32 adjacency + distance vectors + slack, clamped to
    # ~85% of physical VMEM so v7x (64 MiB) never sees an over-request.
    try:
        vmem_cap = int(pltpu.get_tpu_info().vmem_capacity_bytes)
    except Exception:  # not on hardware / interpret mode
        vmem_cap = 64 * 1024 * 1024
    need = n_pad * n_pad * 4 + 8 * n_pad * 4 + (2 << 20)
    vmem_limit = min(int(0.85 * vmem_cap), max(16 << 20, need))

    passes = max(n - 1, 1)
    cost = pl.CostEstimate(
        flops=2 * passes * n_pad * n_pad,       # one add + one min per element/pass
        transcendentals=0,
        bytes_accessed=n_pad * n_pad * 4 + 2 * n_pad * 4,
    )

    dist = pl.pallas_call(
        kernel,
        out_shape=jax.ShapeDtypeStruct((1, n_pad), jnp.float32),
        in_specs=[
            pl.BlockSpec(memory_space=pltpu.MemorySpace.SMEM),
            pl.BlockSpec(memory_space=pltpu.MemorySpace.VMEM),
        ],
        out_specs=pl.BlockSpec(memory_space=pltpu.MemorySpace.VMEM),
        compiler_params=pltpu.CompilerParams(vmem_limit_bytes=vmem_limit),
        cost_estimate=cost,
    )(src, adj_p)
    return dist[0, :n]


class BellmanFordLayerModifiedPallas:
    """JAX/Pallas port of BellmanFordLayerModified."""

    def __init__(self, num_nodes, num_features, key):
        self.num_nodes = num_nodes
        self.num_features = num_features
        k_ew, k_emb = jax.random.split(key)
        # nn.Parameter(torch.rand(N, N)) -- unused in forward, kept for parity.
        self.edge_weights = jax.random.uniform(k_ew, (num_nodes, num_nodes),
                                               dtype=jnp.float32)
        # nn.Embedding(N, F) weight ~ N(0, 1)
        self.node_embedding = jax.random.normal(k_emb, (num_nodes, num_features),
                                                dtype=jnp.float32)

    def __call__(self, adj_matrix, source_node):
        distances = bellman_ford_pallas(adj_matrix, source_node, self.num_nodes)
        # node_embedding(arange(N)) is just the full embedding table.
        node_features = jnp.concatenate(
            [self.node_embedding, distances[:, None]], axis=1)
        graph_diameter = float(jnp.max(distances))
        graph_eccentricity = float(distances[source_node])
        # TODO(synk): the PyTorch `predecessors` tensor is computed but never
        # returned by forward(), so it is intentionally not materialized here.
        return node_features, graph_diameter, graph_eccentricity


def _reference_distances(adj, source, n):
    """NumPy replica of the exact PyTorch triple loop, for validation."""
    adj = np.asarray(adj, dtype=np.float32)
    dist = np.full((n,), np.inf, dtype=np.float32)
    dist[source] = 0.0
    for _ in range(n - 1):
        for s in range(n):
            for d in range(n):
                if s != d and adj[s, d] != np.inf:
                    if dist[s] + adj[s, d] < dist[d]:
                        dist[d] = dist[s] + adj[s, d]
    return dist


if __name__ == "__main__":
    num_nodes = 8
    num_features = 16
    source_node = 0

    key = jax.random.PRNGKey(0)
    k_layer, k_adj, k_mask = jax.random.split(key, 3)

    layer = BellmanFordLayerModifiedPallas(num_nodes, num_features, k_layer)

    # Random weighted adjacency with some missing edges (inf = no edge).
    weights = jax.random.uniform(k_adj, (num_nodes, num_nodes),
                                 dtype=jnp.float32) * 10.0
    no_edge = jax.random.uniform(k_mask, (num_nodes, num_nodes)) > 0.6
    adj_matrix = jnp.where(no_edge, jnp.inf, weights)

    node_features, graph_diameter, graph_eccentricity = layer(adj_matrix,
                                                              source_node)
    node_features = jax.block_until_ready(node_features)

    # Validate final distances against the exact PyTorch-loop semantics.
    ref_dist = _reference_distances(np.array(adj_matrix), source_node, num_nodes)
    got_dist = np.array(node_features[:, -1])
    assert np.allclose(got_dist, ref_dist, equal_nan=True), (got_dist, ref_dist)
    assert node_features.shape == (num_nodes, num_features + 1)

    ref_diam = float(np.max(ref_dist))
    if np.isinf(ref_diam):
        assert np.isinf(graph_diameter)
    else:
        assert np.isclose(graph_diameter, ref_diam), (graph_diameter, ref_diam)
    assert np.isclose(graph_eccentricity, float(ref_dist[source_node]))

    print("KERNEL_OK")
</pallas_src>

<mosaic_0001>
module attributes {stable_mosaic.version = 11 : i64} {
  func.func @kernel(%arg0: memref<1xi32, #tpu.memory_space<smem>>, %arg1: memref<128x128xf32, #tpu.memory_space<vmem>>, %arg2: memref<1x128xf32, #tpu.memory_space<vmem>>) attributes {dimension_semantics = [], scalar_prefetch = 0 : i64, scratch_operands = 0 : i64, tpu.core_type = #tpu.core_type<tc>} {
    %c0 = arith.constant 0 : index
    %0 = memref.load %arg0[%c0] : memref<1xi32, #tpu.memory_space<smem>>
    %1 = tpu.iota {dimensions = array<i32: 1>} : vector<1x128xi32>
    %2 = vector.broadcast %0 : i32 to vector<1x128xi32>
    %3 = arith.cmpi eq, %1, %2 : vector<1x128xi32>
    %cst = arith.constant 0.000000e+00 : f32
    %cst_0 = arith.constant 0x7F800000 : f32
    %4 = vector.broadcast %cst : f32 to vector<1x128xf32>
    %5 = vector.broadcast %cst_0 : f32 to vector<1x128xf32>
    %6 = arith.select %3, %4, %5 : vector<1x128xi1>, vector<1x128xf32>
    %c0_i32 = arith.constant 0 : i32
    %7 = vector.shape_cast %6 : vector<1x128xf32> to vector<128x1xf32>
    %c0_1 = arith.constant 0 : index
    %c0_2 = arith.constant 0 : index
    %8 = vector.load %arg1[%c0_1, %c0_2] : memref<128x128xf32, #tpu.memory_space<vmem>>, vector<128x128xf32>
    %9 = vector.broadcast %7 : vector<128x1xf32> to vector<128x128xf32>
    %10 = arith.addf %9, %8 : vector<128x128xf32>
    %cst_3 = arith.constant dense<0x7F800000> : vector<128xf32>
    %11 = vector.multi_reduction <minimumf>, %10, %cst_3 [0] : vector<128x128xf32> to vector<128xf32>
    %12 = vector.shape_cast %11 : vector<128xf32> to vector<1x128xf32>
    %c1_i32 = arith.constant 1 : i32
    %13 = vector.shape_cast %12 : vector<1x128xf32> to vector<128x1xf32>
    %c0_4 = arith.constant 0 : index
    %c0_5 = arith.constant 0 : index
    %14 = vector.load %arg1[%c0_4, %c0_5] : memref<128x128xf32, #tpu.memory_space<vmem>>, vector<128x128xf32>
    %15 = vector.broadcast %13 : vector<128x1xf32> to vector<128x128xf32>
    %16 = arith.addf %15, %14 : vector<128x128xf32>
    %cst_6 = arith.constant dense<0x7F800000> : vector<128xf32>
    %17 = vector.multi_reduction <minimumf>, %16, %cst_6 [0] : vector<128x128xf32> to vector<128xf32>
    %18 = vector.shape_cast %17 : vector<128xf32> to vector<1x128xf32>
    %c2_i32 = arith.constant 2 : i32
    %19 = vector.shape_cast %18 : vector<1x128xf32> to vector<128x1xf32>
    %c0_7 = arith.constant 0 : index
    %c0_8 = arith.constant 0 : index
    %20 = vector.load %arg1[%c0_7, %c0_8] : memref<128x128xf32, #tpu.memory_space<vmem>>, vector<128x128xf32>
    %21 = vector.broadcast %19 : vector<128x1xf32> to vector<128x128xf32>
    %22 = arith.addf %21, %20 : vector<128x128xf32>
    %cst_9 = arith.constant dense<0x7F800000> : vector<128xf32>
    %23 = vector.multi_reduction <minimumf>, %22, %cst_9 [0] : vector<128x128xf32> to vector<128xf32>
    %24 = vector.shape_cast %23 : vector<128xf32> to vector<1x128xf32>
    %c3_i32 = arith.constant 3 : i32
    %25 = vector.shape_cast %24 : vector<1x128xf32> to vector<128x1xf32>
    %c0_10 = arith.constant 0 : index
    %c0_11 = arith.constant 0 : index
    %26 = vector.load %arg1[%c0_10, %c0_11] : memref<128x128xf32, #tpu.memory_space<vmem>>, vector<128x128xf32>
    %27 = vector.broadcast %25 : vector<128x1xf32> to vector<128x128xf32>
    %28 = arith.addf %27, %26 : vector<128x128xf32>
    %cst_12 = arith.constant dense<0x7F800000> : vector<128xf32>
    %29 = vector.multi_reduction <minimumf>, %28, %cst_12 [0] : vector<128x128xf32> to vector<128xf32>
    %30 = vector.shape_cast %29 : vector<128xf32> to vector<1x128xf32>
    %c4_i32 = arith.constant 4 : i32
    %31 = vector.shape_cast %30 : vector<1x128xf32> to vector<128x1xf32>
    %c0_13 = arith.constant 0 : index
    %c0_14 = arith.constant 0 : index
    %32 = vector.load %arg1[%c0_13, %c0_14] : memref<128x128xf32, #tpu.memory_space<vmem>>, vector<128x128xf32>
    %33 = vector.broadcast %31 : vector<128x1xf32> to vector<128x128xf32>
    %34 = arith.addf %33, %32 : vector<128x128xf32>
    %cst_15 = arith.constant dense<0x7F800000> : vector<128xf32>
    %35 = vector.multi_reduction <minimumf>, %34, %cst_15 [0] : vector<128x128xf32> to vector<128xf32>
    %36 = vector.shape_cast %35 : vector<128xf32> to vector<1x128xf32>
    %c5_i32 = arith.constant 5 : i32
    %37 = vector.shape_cast %36 : vector<1x128xf32> to vector<128x1xf32>
    %c0_16 = arith.constant 0 : index
    %c0_17 = arith.constant 0 : index
    %38 = vector.load %arg1[%c0_16, %c0_17] : memref<128x128xf32, #tpu.memory_space<vmem>>, vector<128x128xf32>
    %39 = vector.broadcast %37 : vector<128x1xf32> to vector<128x128xf32>
    %40 = arith.addf %39, %38 : vector<128x128xf32>
    %cst_18 = arith.constant dense<0x7F800000> : vector<128xf32>
    %41 = vector.multi_reduction <minimumf>, %40, %cst_18 [0] : vector<128x128xf32> to vector<128xf32>
    %42 = vector.shape_cast %41 : vector<128xf32> to vector<1x128xf32>
    %c6_i32 = arith.constant 6 : i32
    %43 = vector.shape_cast %42 : vector<1x128xf32> to vector<128x1xf32>
    %c0_19 = arith.constant 0 : index
    %c0_20 = arith.constant 0 : index
    %44 = vector.load %arg1[%c0_19, %c0_20] : memref<128x128xf32, #tpu.memory_space<vmem>>, vector<128x128xf32>
    %45 = vector.broadcast %43 : vector<128x1xf32> to vector<128x128xf32>
    %46 = arith.addf %45, %44 : vector<128x128xf32>
    %cst_21 = arith.constant dense<0x7F800000> : vector<128xf32>
    %47 = vector.multi_reduction <minimumf>, %46, %cst_21 [0] : vector<128x128xf32> to vector<128xf32>
    %48 = vector.shape_cast %47 : vector<128xf32> to vector<1x128xf32>
    %c0_22 = arith.constant 0 : index
    %c0_23 = arith.constant 0 : index
    %49 = vector.load %arg2[%c0_22, %c0_23] : memref<1x128xf32, #tpu.memory_space<vmem>>, vector<1x128xf32>
    tpu.vector_store %arg2[%c0_22, %c0_23], %48 {strides = array<i32>} : memref<1x128xf32, #tpu.memory_space<vmem>>, vector<1x128xf32>,
    return
  }
}

</mosaic_0001>

<bundles_post_ra>
// kernel: tpu_custom_call.1
= control target key start
LH: loop header
LB: loop body
LE: loop exit
PB: predicated region body
PF: predicated region fallthrough
CT: control target
= control target key end

     0   :  { %8 = vsyncpa [#allocation4], 0  ;;  %s1009_s0 = inlined_call_operand.<no memory space> [shape: s32[1], index: 0, kind: input, shape index: {}]   ;;  %s1010_s1 = inlined_call_operand.hbm [shape: f32[128,128], index: 1, kind: input, shape index: {}]   ;;  %s1011_s2 = inlined_call_operand.hbm [shape: f32[1,128], index: 2, kind: output, shape index: {}]  }
   0x1   :  { %9 = vsyncpa [#allocation5], 0  ;;  %s818_s9 = smov [#allocation3]   ;;  %s770_s13 = scalar_lea.hbm %s1010_s1, 2048 }
   0x2   :  { %s17_s10 = sshll.u32 %s818_s9, 4  ;;  %p771_p0 = scmp.ne.s32.totalorder %s1010_s1, %s770_s13  ;;  %s18_s10 = int_to_ptr.vmem [resolvable:$true] %s17_s10 }
   0x3   :  { %p774_p1 = scmp.lt.u32.totalorder %s770_s13, %s1010_s1 }
   0x5   :  { %p776_p2 = pnand %p774_p1, %p771_p0 }
   0x7   :  { %779 = shalt.err (!%p776_p2)
}
   0x8   :  { %s780_s18 = scalar_lea.vmem %s18_s10, 2048  ;;  %p785_p4 = scmp.lt.s32.totalorder %s18_s10, %s18_s10 }
   0x9   :  { %p781_p3 = scmp.ne.s32.totalorder %s18_s10, %s780_s18  ;;  %p786_p5 = scmp.lt.s32.totalorder %s780_s18, %s780_s18 }
   0xb   :  { %p787_p6 = por %p786_p5, %p785_p4 }
   0xd   :  { %p788_p7 = pnand %p787_p6, %p781_p3 }
   0xf   :  { %791 = shalt.err (!%p788_p7)
}
  0x10   :  { %s819_s19 = smov 128   ;;  %s820_s20 = smov 8   ;;  %v28_v0 = vlaneseq }
  0x11   :  { %23 = dma.hbm_to_vmem [thread:$0]  %s1010_s1, 2048, %s18_s10, [#allocation4], %s819_s19, %s819_s19, %s820_s20  }
  0x12   :  { %814 = dma.done.wait [#allocation4], 2048  }
  0x13   :  { %815 = vsyncadd [#allocation4], 4294965248  ;;  %v30_v1 = vstv %s1009_s0  ;;  %v29_v2 = vand.u32 127, %v28_v0  ;;  %v821_v3 = vmov inf   ;;  %v853_v15 = vld [vmem:[#allocation3 + $0x28] sm:$0xff]  ;;  %v855_v16 = vld [vmem:[#allocation3 + $0x20] sm:$0xff] }
  0x14   :  { %v857_v17 = vld [vmem:[#allocation3 + $0x10] sm:$0xff]  ;;  %v859_v18 = vld [vmem:[#allocation3] sm:$0xff]  ;;  %v861_v19 = vld [vmem:[#allocation3 + $0x38] sm:$0xff]  ;;  %s822_s0 = smov [#allocation6]  }
  0x15   :  { %vm31_vm0 = vcmp.eq.s32.totalorder %v29_v2, %v30_v1  ;;  %v863_v20 = vld [vmem:[#allocation3 + $0x30] sm:$0xff]  ;;  %v865_v21 = vld [vmem:[#allocation3 + $0x8] sm:$0xff]  ;;  %v869_v23 = vld [vmem:[#allocation3 + $0x40] sm:$0xff]  ;;  %s756_s1 = sshll.u32 %s822_s0, 4  ;;  %s757_s1 = int_to_ptr.vmem [resolvable:$true] %s756_s1 }
  0x16   :  { %v32_v4 = vsel %vm31_vm0, 0.0, %v821_v3  ;;  %v867_v22 = vld [vmem:[#allocation3 + $0x48] sm:$0xff]  ;;  %v871_v26 = vld [vmem:[#allocation3 + $0x18] sm:$0xff]  ;;  %v877_v30 = vld [vmem:[#allocation3 + $0x50] sm:$0xff]  ;;  %s792_s25 = scalar_lea.vmem %s757_s1, 16  ;;  %s796_s26 = scalar_lea.vmem %s757_s1, 32 }
  0x17   :  { %42 = vbcast.lane.b32.xlu1 %v32_v4, 272  ;;  %34 = vbcast.lane.b32.xlu0 %v32_v4, 256  ;;  %v875_v29 = vld [vmem:[#allocation3 + $0x58] sm:$0xff]  ;;  %v881_v33 = vld [vmem:[#allocation3 + $0x68] sm:$0xff]  ;;  %v883_v34 = vld [vmem:[#allocation3 + $0x60] sm:$0xff]  ;;  %p793_p8 = scmp.ne.s32.totalorder %s757_s1, %s792_s25  ;;  %p797_p9 = scmp.lt.s32.totalorder %s757_s1, %s757_s1 }
  0x18   :  { %v895_v51 = vld [vmem:[#allocation3 + $0x78] sm:$0xff]  ;;  %v897_v52 = vld [vmem:[#allocation3 + $0x70] sm:$0xff]  ;;  %p798_p10 = scmp.lt.s32.totalorder %s796_s26, %s792_s25 }
  0x1a   :  { %p799_p11 = por %p798_p10, %p797_p9 }
  0x1b   :  { %46 = vbcast.lane.b32.xlu1 %v32_v4, 280  ;;  %38 = vbcast.lane.b32.xlu0 %v32_v4, 264 }
  0x1c   :  { %p800_p12 = pnand %p799_p11, %p793_p8 }
  0x1f   :  { %54 = vbcast.lane.b32.xlu1 %v32_v4, 296  ;;  %50 = vbcast.lane.b32.xlu0 %v32_v4, 288 }
  0x23   :  { %62 = vbcast.lane.b32.xlu1 %v32_v4, 312  ;;  %58 = vbcast.lane.b32.xlu0 %v32_v4, 304 }
  0x27   :  { %70 = vbcast.lane.b32.xlu1 %v32_v4, 328  ;;  %66 = vbcast.lane.b32.xlu0 %v32_v4, 320 }
  0x2b   :  { %78 = vbcast.lane.b32.xlu1 %v32_v4, 344  ;;  %74 = vbcast.lane.b32.xlu0 %v32_v4, 336 }
  0x2f   :  { %86 = vbcast.lane.b32.xlu1 %v32_v4, 360  ;;  %82 = vbcast.lane.b32.xlu0 %v32_v4, 352 }
  0x33   :  { %94 = vbcast.lane.b32.xlu1 %v32_v4, 376  ;;  %90 = vbcast.lane.b32.xlu0 %v32_v4, 368 }
  0x89   :  { %v43_v5 = vpop.permute.xlu1 %42  ;;  %v35_v6 = vpop.permute.xlu0 %34 }
  0x8a   :  { %v112_v35 = vadd.f32 %v859_v18, %v35_v6  ;;  %v114_v39 = vadd.f32 %v857_v17, %v43_v5 }
  0x8d   :  { %v47_v7 = vpop.permute.xlu1 %46  ;;  %v39_v8 = vpop.permute.xlu0 %38 }
  0x8e   :  { %v113_v36 = vadd.f32 %v865_v21, %v39_v8  ;;  %v115_v40 = vadd.f32 %v871_v26, %v47_v7 }
  0x91   :  { %v55_v9 = vpop.permute.xlu1 %54  ;;  %v51_v10 = vpop.permute.xlu0 %50 }
  0x92   :  { %v117_v27 = vadd.f32 %v853_v15, %v55_v9  ;;  %v116_v28 = vadd.f32 %v855_v16, %v51_v10 }
  0x94   :  { %v129_v45 = vmin.f32 %v113_v36, %v117_v27  ;;  %v128_v46 = vmin.f32 %v112_v35, %v116_v28 }
  0x95   :  { %v63_v11 = vpop.permute.xlu1 %62  ;;  %v59_v12 = vpop.permute.xlu0 %58 }
  0x96   :  { %v119_v31 = vadd.f32 %v861_v19, %v63_v11  ;;  %v118_v32 = vadd.f32 %v863_v20, %v59_v12 }
  0x98   :  { %v131_v49 = vmin.f32 %v115_v40, %v119_v31  ;;  %v130_v50 = vmin.f32 %v114_v39, %v118_v32 }
  0x99   :  { %v71_v13 = vpop.permute.xlu1 %70  ;;  %v67_v14 = vpop.permute.xlu0 %66 }
  0x9a   :  { %v121_v37 = vadd.f32 %v867_v22, %v71_v13  ;;  %v120_v38 = vadd.f32 %v869_v23, %v67_v14 }
  0x9c   :  { %v133_v53 = vmin.f32 %v129_v45, %v121_v37  ;;  %v132_v54 = vmin.f32 %v128_v46, %v120_v38 }
  0x9d   :  { %v79_v24 = vpop.permute.xlu1 %78  ;;  %v75_v25 = vpop.permute.xlu0 %74 }
  0x9e   :  { %v123_v41 = vadd.f32 %v875_v29, %v79_v24  ;;  %v122_v42 = vadd.f32 %v877_v30, %v75_v25 }
  0xa0   :  { %v135_v55 = vmin.f32 %v131_v49, %v123_v41  ;;  %v134_v56 = vmin.f32 %v130_v50, %v122_v42 }
  0xa1   :  { %v87_v43 = vpop.permute.xlu1 %86  ;;  %v83_v44 = vpop.permute.xlu0 %82 }
  0xa2   :  { %v125_v47 = vadd.f32 %v881_v33, %v87_v43  ;;  %v124_v48 = vadd.f32 %v883_v34, %v83_v44 }
  0xa4   :  { %v137_v59 = vmin.f32 %v133_v53, %v125_v47  ;;  %v136_v60 = vmin.f32 %v132_v54, %v124_v48 }
  0xa5   :  { %v95_v57 = vpop.permute.xlu1 %94  ;;  %v91_v58 = vpop.permute.xlu0 %90 }
  0xa6   :  { %v127_v61 = vadd.f32 %v895_v51, %v95_v57  ;;  %v126_v62 = vadd.f32 %v897_v52, %v91_v58  ;;  %v140_v1 = vmin.f32 %v136_v60, %v137_v59 }
  0xa8   :  { %v139_v63 = vmin.f32 %v135_v55, %v127_v61  ;;  %v138_v0 = vmin.f32 %v134_v56, %v126_v62 }
  0xaa   :  { %v141_v2 = vmin.f32 %v138_v0, %v139_v63 }
  0xac   :  { %v142_v3 = vmin.f32 %v140_v1, %v141_v2 }
  0xae   :  { %v143_v4 = vrot.slane %v142_v3, 4 }
  0xb0   :  { %v144_v5 = vmin.f32 %v142_v3, %v143_v4 }
  0xb2   :  { %v145_v6 = vrot.slane %v144_v5, 2 }
  0xb4   :  { %v146_v7 = vmin.f32 %v144_v5, %v145_v6 }
  0xb6   :  { %v147_v8 = vrot.slane %v146_v7, 1 }
  0xb8   :  { %v148_v9 = vmin.f32 %v146_v7, %v147_v8 }
  0xba   :  { %154 = vbcast.lane.b32.xlu1 %v148_v9, 264  ;;  %150 = vbcast.lane.b32.xlu0 %v148_v9, 256 }
  0xbe   :  { %162 = vbcast.lane.b32.xlu1 %v148_v9, 280  ;;  %158 = vbcast.lane.b32.xlu0 %v148_v9, 272 }
  0xc2   :  { %170 = vbcast.lane.b32.xlu1 %v148_v9, 296  ;;  %166 = vbcast.lane.b32.xlu0 %v148_v9, 288 }
  0xc6   :  { %178 = vbcast.lane.b32.xlu1 %v148_v9, 312  ;;  %174 = vbcast.lane.b32.xlu0 %v148_v9, 304 }
  0xca   :  { %186 = vbcast.lane.b32.xlu1 %v148_v9, 328  ;;  %182 = vbcast.lane.b32.xlu0 %v148_v9, 320 }
  0xce   :  { %194 = vbcast.lane.b32.xlu1 %v148_v9, 344  ;;  %190 = vbcast.lane.b32.xlu0 %v148_v9, 336 }
  0xd2   :  { %202 = vbcast.lane.b32.xlu1 %v148_v9, 360  ;;  %198 = vbcast.lane.b32.xlu0 %v148_v9, 352 }
  0xd6   :  { %210 = vbcast.lane.b32.xlu1 %v148_v9, 376  ;;  %206 = vbcast.lane.b32.xlu0 %v148_v9, 368 }
 0x12c   :  { %v155_v10 = vpop.permute.xlu1 %154  ;;  %v151_v11 = vpop.permute.xlu0 %150 }
 0x12d   :  { %v213_v40 = vadd.f32 %v155_v10, %v865_v21  ;;  %v212_v41 = vadd.f32 %v151_v11, %v859_v18 }
 0x130   :  { %v163_v12 = vpop.permute.xlu1 %162  ;;  %v159_v13 = vpop.permute.xlu0 %158 }
 0x131   :  { %v215_v44 = vadd.f32 %v163_v12, %v871_v26  ;;  %v214_v45 = vadd.f32 %v159_v13, %v857_v17 }
 0x134   :  { %v171_v14 = vpop.permute.xlu1 %170  ;;  %v167_v24 = vpop.permute.xlu0 %166 }
 0x135   :  { %v217_v36 = vadd.f32 %v171_v14, %v853_v15  ;;  %v216_v37 = vadd.f32 %v167_v24, %v855_v16 }
 0x137   :  { %v229_v50 = vmin.f32 %v213_v40, %v217_v36  ;;  %v228_v53 = vmin.f32 %v212_v41, %v216_v37 }
 0x138   :  { %v179_v25 = vpop.permute.xlu1 %178  ;;  %v175_v27 = vpop.permute.xlu0 %174 }
 0x139   :  { %v219_v38 = vadd.f32 %v179_v25, %v861_v19  ;;  %v218_v39 = vadd.f32 %v175_v27, %v863_v20 }
 0x13b   :  { %v231_v56 = vmin.f32 %v215_v44, %v219_v38  ;;  %v230_v57 = vmin.f32 %v214_v45, %v218_v39 }
 0x13c   :  { %v187_v28 = vpop.permute.xlu1 %186  ;;  %v183_v31 = vpop.permute.xlu0 %182 }
 0x13d   :  { %v221_v42 = vadd.f32 %v187_v28, %v867_v22  ;;  %v220_v43 = vadd.f32 %v183_v31, %v869_v23 }
 0x13f   :  { %v233_v58 = vmin.f32 %v229_v50, %v221_v42  ;;  %v232_v59 = vmin.f32 %v228_v53, %v220_v43 }
 0x140   :  { %v195_v32 = vpop.permute.xlu1 %194  ;;  %v191_v35 = vpop.permute.xlu0 %190 }
 0x141   :  { %v223_v46 = vadd.f32 %v195_v32, %v875_v29  ;;  %v222_v47 = vadd.f32 %v191_v35, %v877_v30 }
 0x143   :  { %v235_v60 = vmin.f32 %v231_v56, %v223_v46  ;;  %v234_v61 = vmin.f32 %v230_v57, %v222_v47 }
 0x144   :  { %v203_v48 = vpop.permute.xlu1 %202  ;;  %v199_v49 = vpop.permute.xlu0 %198 }
 0x145   :  { %v225_v54 = vadd.f32 %v203_v48, %v881_v33  ;;  %v224_v55 = vadd.f32 %v199_v49, %v883_v34 }
 0x147   :  { %v237_v0 = vmin.f32 %v233_v58, %v225_v54  ;;  %v236_v1 = vmin.f32 %v232_v59, %v224_v55 }
 0x148   :  { %v211_v62 = vpop.permute.xlu1 %210  ;;  %v207_v63 = vpop.permute.xlu0 %206 }
 0x149   :  { %v227_v2 = vadd.f32 %v211_v62, %v895_v51  ;;  %v226_v3 = vadd.f32 %v207_v63, %v897_v52  ;;  %v240_v6 = vmin.f32 %v236_v1, %v237_v0 }
 0x14b   :  { %v239_v4 = vmin.f32 %v235_v60, %v227_v2  ;;  %v238_v5 = vmin.f32 %v234_v61, %v226_v3 }
 0x14d   :  { %v241_v7 = vmin.f32 %v238_v5, %v239_v4 }
 0x14f   :  { %v242_v8 = vmin.f32 %v240_v6, %v241_v7 }
 0x151   :  { %v243_v9 = vrot.slane %v242_v8, 4 }
 0x153   :  { %v244_v10 = vmin.f32 %v242_v8, %v243_v9 }
 0x155   :  { %v245_v11 = vrot.slane %v244_v10, 2 }
 0x157   :  { %v246_v12 = vmin.f32 %v244_v10, %v245_v11 }
 0x159   :  { %v247_v13 = vrot.slane %v246_v12, 1 }
 0x15b   :  { %v248_v14 = vmin.f32 %v246_v12, %v247_v13 }
 0x15d   :  { %254 = vbcast.lane.b32.xlu1 %v248_v14, 264  ;;  %250 = vbcast.lane.b32.xlu0 %v248_v14, 256 }
 0x161   :  { %262 = vbcast.lane.b32.xlu1 %v248_v14, 280  ;;  %258 = vbcast.lane.b32.xlu0 %v248_v14, 272 }
 0x165   :  { %270 = vbcast.lane.b32.xlu1 %v248_v14, 296  ;;  %266 = vbcast.lane.b32.xlu0 %v248_v14, 288 }
 0x169   :  { %278 = vbcast.lane.b32.xlu1 %v248_v14, 312  ;;  %274 = vbcast.lane.b32.xlu0 %v248_v14, 304 }
 0x16d   :  { %286 = vbcast.lane.b32.xlu1 %v248_v14, 328  ;;  %282 = vbcast.lane.b32.xlu0 %v248_v14, 320 }
 0x171   :  { %294 = vbcast.lane.b32.xlu1 %v248_v14, 344  ;;  %290 = vbcast.lane.b32.xlu0 %v248_v14, 336 }
 0x175   :  { %302 = vbcast.lane.b32.xlu1 %v248_v14, 360  ;;  %298 = vbcast.lane.b32.xlu0 %v248_v14, 352 }
 0x179   :  { %310 = vbcast.lane.b32.xlu1 %v248_v14, 376  ;;  %306 = vbcast.lane.b32.xlu0 %v248_v14, 368 }
 0x1cf   :  { %v255_v24 = vpop.permute.xlu1 %254  ;;  %v251_v25 = vpop.permute.xlu0 %250 }
 0x1d0   :  { %v313_v45 = vadd.f32 %v255_v24, %v865_v21  ;;  %v312_v46 = vadd.f32 %v251_v25, %v859_v18 }
 0x1d3   :  { %v263_v27 = vpop.permute.xlu1 %262  ;;  %v259_v28 = vpop.permute.xlu0 %258 }
 0x1d4   :  { %v315_v49 = vadd.f32 %v263_v27, %v871_v26  ;;  %v314_v50 = vadd.f32 %v259_v28, %v857_v17 }
 0x1d7   :  { %v271_v31 = vpop.permute.xlu1 %270  ;;  %v267_v32 = vpop.permute.xlu0 %266 }
 0x1d8   :  { %v317_v41 = vadd.f32 %v271_v31, %v853_v15  ;;  %v316_v42 = vadd.f32 %v267_v32, %v855_v16 }
 0x1da   :  { %v329_v57 = vmin.f32 %v313_v45, %v317_v41  ;;  %v328_v58 = vmin.f32 %v312_v46, %v316_v42 }
 0x1db   :  { %v279_v35 = vpop.permute.xlu1 %278  ;;  %v275_v36 = vpop.permute.xlu0 %274 }
 0x1dc   :  { %v319_v43 = vadd.f32 %v279_v35, %v861_v19  ;;  %v318_v44 = vadd.f32 %v275_v36, %v863_v20 }
 0x1de   :  { %v331_v61 = vmin.f32 %v315_v49, %v319_v43  ;;  %v330_v62 = vmin.f32 %v314_v50, %v318_v44 }
 0x1df   :  { %v287_v37 = vpop.permute.xlu1 %286  ;;  %v283_v38 = vpop.permute.xlu0 %282 }
 0x1e0   :  { %v321_v47 = vadd.f32 %v287_v37, %v867_v22  ;;  %v320_v48 = vadd.f32 %v283_v38, %v869_v23 }
 0x1e2   :  { %v333_v63 = vmin.f32 %v329_v57, %v321_v47  ;;  %v332_v0 = vmin.f32 %v328_v58, %v320_v48 }
 0x1e3   :  { %v295_v39 = vpop.permute.xlu1 %294  ;;  %v291_v40 = vpop.permute.xlu0 %290 }
 0x1e4   :  { %v323_v53 = vadd.f32 %v295_v39, %v875_v29  ;;  %v322_v54 = vadd.f32 %v291_v40, %v877_v30 }
 0x1e6   :  { %v335_v1 = vmin.f32 %v331_v61, %v323_v53  ;;  %v334_v2 = vmin.f32 %v330_v62, %v322_v54 }
 0x1e7   :  { %v303_v55 = vpop.permute.xlu1 %302  ;;  %v299_v56 = vpop.permute.xlu0 %298 }
 0x1e8   :  { %v325_v59 = vadd.f32 %v303_v55, %v881_v33  ;;  %v324_v60 = vadd.f32 %v299_v56, %v883_v34 }
 0x1ea   :  { %v337_v5 = vmin.f32 %v333_v63, %v325_v59  ;;  %v336_v6 = vmin.f32 %v332_v0, %v324_v60 }
 0x1eb   :  { %v311_v3 = vpop.permute.xlu1 %310  ;;  %v307_v4 = vpop.permute.xlu0 %306 }
 0x1ec   :  { %v327_v7 = vadd.f32 %v311_v3, %v895_v51  ;;  %v326_v8 = vadd.f32 %v307_v4, %v897_v52  ;;  %v340_v11 = vmin.f32 %v336_v6, %v337_v5 }
 0x1ee   :  { %v339_v9 = vmin.f32 %v335_v1, %v327_v7  ;;  %v338_v10 = vmin.f32 %v334_v2, %v326_v8 }
 0x1f0   :  { %v341_v12 = vmin.f32 %v338_v10, %v339_v9 }
 0x1f2   :  { %v342_v13 = vmin.f32 %v340_v11, %v341_v12 }
 0x1f4   :  { %v343_v14 = vrot.slane %v342_v13, 4 }
 0x1f6   :  { %v344_v24 = vmin.f32 %v342_v13, %v343_v14 }
 0x1f8   :  { %v345_v25 = vrot.slane %v344_v24, 2 }
 0x1fa   :  { %v346_v27 = vmin.f32 %v344_v24, %v345_v25 }
 0x1fc   :  { %v347_v28 = vrot.slane %v346_v27, 1 }
 0x1fe   :  { %v348_v31 = vmin.f32 %v346_v27, %v347_v28 }
 0x200   :  { %354 = vbcast.lane.b32.xlu1 %v348_v31, 264  ;;  %350 = vbcast.lane.b32.xlu0 %v348_v31, 256 }
 0x204   :  { %362 = vbcast.lane.b32.xlu1 %v348_v31, 280  ;;  %358 = vbcast.lane.b32.xlu0 %v348_v31, 272 }
 0x208   :  { %370 = vbcast.lane.b32.xlu1 %v348_v31, 296  ;;  %366 = vbcast.lane.b32.xlu0 %v348_v31, 288 }
 0x20c   :  { %378 = vbcast.lane.b32.xlu1 %v348_v31, 312  ;;  %374 = vbcast.lane.b32.xlu0 %v348_v31, 304 }
 0x210   :  { %386 = vbcast.lane.b32.xlu1 %v348_v31, 328  ;;  %382 = vbcast.lane.b32.xlu0 %v348_v31, 320 }
 0x214   :  { %394 = vbcast.lane.b32.xlu1 %v348_v31, 344  ;;  %390 = vbcast.lane.b32.xlu0 %v348_v31, 336 }
 0x218   :  { %402 = vbcast.lane.b32.xlu1 %v348_v31, 360  ;;  %398 = vbcast.lane.b32.xlu0 %v348_v31, 352 }
 0x21c   :  { %410 = vbcast.lane.b32.xlu1 %v348_v31, 376  ;;  %406 = vbcast.lane.b32.xlu0 %v348_v31, 368 }
 0x272   :  { %v355_v32 = vpop.permute.xlu1 %354  ;;  %v351_v35 = vpop.permute.xlu0 %350 }
 0x273   :  { %v413_v50 = vadd.f32 %v355_v32, %v865_v21  ;;  %v412_v53 = vadd.f32 %v351_v35, %v859_v18 }
 0x276   :  { %v363_v36 = vpop.permute.xlu1 %362  ;;  %v359_v37 = vpop.permute.xlu0 %358 }
 0x277   :  { %v415_v56 = vadd.f32 %v363_v36, %v871_v26  ;;  %v414_v57 = vadd.f32 %v359_v37, %v857_v17 }
 0x27a   :  { %v371_v38 = vpop.permute.xlu1 %370  ;;  %v367_v39 = vpop.permute.xlu0 %366 }
 0x27b   :  { %v417_v46 = vadd.f32 %v371_v38, %v853_v15  ;;  %v416_v47 = vadd.f32 %v367_v39, %v855_v16 }
 0x27d   :  { %v429_v62 = vmin.f32 %v413_v50, %v417_v46  ;;  %v428_v63 = vmin.f32 %v412_v53, %v416_v47 }
 0x27e   :  { %v379_v40 = vpop.permute.xlu1 %378  ;;  %v375_v41 = vpop.permute.xlu0 %374 }
 0x27f   :  { %v419_v48 = vadd.f32 %v379_v40, %v861_v19  ;;  %v418_v49 = vadd.f32 %v375_v41, %v863_v20 }
 0x281   :  { %v431_v2 = vmin.f32 %v415_v56, %v419_v48  ;;  %v430_v3 = vmin.f32 %v414_v57, %v418_v49 }
 0x282   :  { %v387_v42 = vpop.permute.xlu1 %386  ;;  %v383_v43 = vpop.permute.xlu0 %382 }
 0x283   :  { %v421_v54 = vadd.f32 %v387_v42, %v867_v22  ;;  %v420_v55 = vadd.f32 %v383_v43, %v869_v23 }
 0x285   :  { %v433_v4 = vmin.f32 %v429_v62, %v421_v54  ;;  %v432_v5 = vmin.f32 %v428_v63, %v420_v55 }
 0x286   :  { %v395_v44 = vpop.permute.xlu1 %394  ;;  %v391_v45 = vpop.permute.xlu0 %390 }
 0x287   :  { %v423_v58 = vadd.f32 %v395_v44, %v875_v29  ;;  %v422_v59 = vadd.f32 %v391_v45, %v877_v30 }
 0x289   :  { %v435_v6 = vmin.f32 %v431_v2, %v423_v58  ;;  %v434_v7 = vmin.f32 %v430_v3, %v422_v59 }
 0x28a   :  { %v403_v60 = vpop.permute.xlu1 %402  ;;  %v399_v61 = vpop.permute.xlu0 %398 }
 0x28b   :  { %v425_v0 = vadd.f32 %v403_v60, %v881_v33  ;;  %v424_v1 = vadd.f32 %v399_v61, %v883_v34 }
 0x28d   :  { %v437_v10 = vmin.f32 %v433_v4, %v425_v0  ;;  %v436_v11 = vmin.f32 %v432_v5, %v424_v1 }
 0x28e   :  { %v411_v8 = vpop.permute.xlu1 %410  ;;  %v407_v9 = vpop.permute.xlu0 %406 }
 0x28f   :  { %v427_v12 = vadd.f32 %v411_v8, %v895_v51  ;;  %v426_v13 = vadd.f32 %v407_v9, %v897_v52  ;;  %v440_v25 = vmin.f32 %v436_v11, %v437_v10 }
 0x291   :  { %v439_v14 = vmin.f32 %v435_v6, %v427_v12  ;;  %v438_v24 = vmin.f32 %v434_v7, %v426_v13 }
 0x293   :  { %v441_v27 = vmin.f32 %v438_v24, %v439_v14 }
 0x295   :  { %v442_v28 = vmin.f32 %v440_v25, %v441_v27 }
 0x297   :  { %v443_v31 = vrot.slane %v442_v28, 4 }
 0x299   :  { %v444_v32 = vmin.f32 %v442_v28, %v443_v31 }
 0x29b   :  { %v445_v35 = vrot.slane %v444_v32, 2 }
 0x29d   :  { %v446_v36 = vmin.f32 %v444_v32, %v445_v35 }
 0x29f   :  { %v447_v37 = vrot.slane %v446_v36, 1 }
 0x2a1   :  { %v448_v38 = vmin.f32 %v446_v36, %v447_v37 }
 0x2a3   :  { %454 = vbcast.lane.b32.xlu1 %v448_v38, 264  ;;  %450 = vbcast.lane.b32.xlu0 %v448_v38, 256 }
 0x2a7   :  { %462 = vbcast.lane.b32.xlu1 %v448_v38, 280  ;;  %458 = vbcast.lane.b32.xlu0 %v448_v38, 272 }
 0x2ab   :  { %470 = vbcast.lane.b32.xlu1 %v448_v38, 296  ;;  %466 = vbcast.lane.b32.xlu0 %v448_v38, 288 }
 0x2af   :  { %478 = vbcast.lane.b32.xlu1 %v448_v38, 312  ;;  %474 = vbcast.lane.b32.xlu0 %v448_v38, 304 }
 0x2b3   :  { %486 = vbcast.lane.b32.xlu1 %v448_v38, 328  ;;  %482 = vbcast.lane.b32.xlu0 %v448_v38, 320 }
 0x2b7   :  { %494 = vbcast.lane.b32.xlu1 %v448_v38, 344  ;;  %490 = vbcast.lane.b32.xlu0 %v448_v38, 336 }
 0x2bb   :  { %502 = vbcast.lane.b32.xlu1 %v448_v38, 360  ;;  %498 = vbcast.lane.b32.xlu0 %v448_v38, 352 }
 0x2bf   :  { %510 = vbcast.lane.b32.xlu1 %v448_v38, 376  ;;  %506 = vbcast.lane.b32.xlu0 %v448_v38, 368 }
 0x315   :  { %v455_v39 = vpop.permute.xlu1 %454  ;;  %v451_v40 = vpop.permute.xlu0 %450 }
 0x316   :  { %v513_v57 = vadd.f32 %v455_v39, %v865_v21  ;;  %v512_v58 = vadd.f32 %v451_v40, %v859_v18 }
 0x319   :  { %v463_v41 = vpop.permute.xlu1 %462  ;;  %v459_v42 = vpop.permute.xlu0 %458 }
 0x31a   :  { %v515_v61 = vadd.f32 %v463_v41, %v871_v26  ;;  %v514_v62 = vadd.f32 %v459_v42, %v857_v17 }
 0x31d   :  { %v471_v43 = vpop.permute.xlu1 %470  ;;  %v467_v44 = vpop.permute.xlu0 %466 }
 0x31e   :  { %v517_v53 = vadd.f32 %v471_v43, %v853_v15  ;;  %v516_v54 = vadd.f32 %v467_v44, %v855_v16 }
 0x320   :  { %v529_v3 = vmin.f32 %v513_v57, %v517_v53  ;;  %v528_v4 = vmin.f32 %v512_v58, %v516_v54 }
 0x321   :  { %v479_v45 = vpop.permute.xlu1 %478  ;;  %v475_v46 = vpop.permute.xlu0 %474 }
 0x322   :  { %v519_v55 = vadd.f32 %v479_v45, %v861_v19  ;;  %v518_v56 = vadd.f32 %v475_v46, %v863_v20 }
 0x324   :  { %v531_v7 = vmin.f32 %v515_v61, %v519_v55  ;;  %v530_v8 = vmin.f32 %v514_v62, %v518_v56 }
 0x325   :  { %v487_v47 = vpop.permute.xlu1 %486  ;;  %v483_v48 = vpop.permute.xlu0 %482 }
 0x326   :  { %v521_v59 = vadd.f32 %v487_v47, %v867_v22  ;;  %v520_v60 = vadd.f32 %v483_v48, %v869_v23 }
 0x328   :  { %v533_v9 = vmin.f32 %v529_v3, %v521_v59  ;;  %v532_v10 = vmin.f32 %v528_v4, %v520_v60 }
 0x329   :  { %v495_v49 = vpop.permute.xlu1 %494  ;;  %v491_v50 = vpop.permute.xlu0 %490 }
 0x32a   :  { %v523_v63 = vadd.f32 %v495_v49, %v875_v29  ;;  %v522_v0 = vadd.f32 %v491_v50, %v877_v30 }
 0x32c   :  { %v535_v11 = vmin.f32 %v531_v7, %v523_v63  ;;  %v534_v12 = vmin.f32 %v530_v8, %v522_v0 }
 0x32d   :  { %v503_v1 = vpop.permute.xlu1 %502  ;;  %v499_v2 = vpop.permute.xlu0 %498 }
 0x32e   :  { %v525_v5 = vadd.f32 %v503_v1, %v881_v33  ;;  %v524_v6 = vadd.f32 %v499_v2, %v883_v34 }
 0x330   :  { %v537_v24 = vmin.f32 %v533_v9, %v525_v5  ;;  %v536_v25 = vmin.f32 %v532_v10, %v524_v6 }
 0x331   :  { %v511_v13 = vpop.permute.xlu1 %510  ;;  %v507_v14 = vpop.permute.xlu0 %506 }
 0x332   :  { %v527_v27 = vadd.f32 %v511_v13, %v895_v51  ;;  %v526_v28 = vadd.f32 %v507_v14, %v897_v52  ;;  %v540_v35 = vmin.f32 %v536_v25, %v537_v24 }
 0x334   :  { %v539_v31 = vmin.f32 %v535_v11, %v527_v27  ;;  %v538_v32 = vmin.f32 %v534_v12, %v526_v28 }
 0x336   :  { %v541_v36 = vmin.f32 %v538_v32, %v539_v31 }
 0x338   :  { %v542_v37 = vmin.f32 %v540_v35, %v541_v36 }
 0x33a   :  { %v543_v38 = vrot.slane %v542_v37, 4 }
 0x33c   :  { %v544_v39 = vmin.f32 %v542_v37, %v543_v38 }
 0x33e   :  { %v545_v40 = vrot.slane %v544_v39, 2 }
 0x340   :  { %v546_v41 = vmin.f32 %v544_v39, %v545_v40 }
 0x342   :  { %v547_v42 = vrot.slane %v546_v41, 1 }
 0x344   :  { %v548_v43 = vmin.f32 %v546_v41, %v547_v42 }
 0x346   :  { %554 = vbcast.lane.b32.xlu1 %v548_v43, 264  ;;  %550 = vbcast.lane.b32.xlu0 %v548_v43, 256 }
 0x34a   :  { %562 = vbcast.lane.b32.xlu1 %v548_v43, 280  ;;  %558 = vbcast.lane.b32.xlu0 %v548_v43, 272 }
 0x34e   :  { %570 = vbcast.lane.b32.xlu1 %v548_v43, 296  ;;  %566 = vbcast.lane.b32.xlu0 %v548_v43, 288 }
 0x352   :  { %578 = vbcast.lane.b32.xlu1 %v548_v43, 312  ;;  %574 = vbcast.lane.b32.xlu0 %v548_v43, 304 }
 0x356   :  { %586 = vbcast.lane.b32.xlu1 %v548_v43, 328  ;;  %582 = vbcast.lane.b32.xlu0 %v548_v43, 320 }
 0x35a   :  { %594 = vbcast.lane.b32.xlu1 %v548_v43, 344  ;;  %590 = vbcast.lane.b32.xlu0 %v548_v43, 336 }
 0x35e   :  { %602 = vbcast.lane.b32.xlu1 %v548_v43, 360  ;;  %598 = vbcast.lane.b32.xlu0 %v548_v43, 352 }
 0x362   :  { %610 = vbcast.lane.b32.xlu1 %v548_v43, 376  ;;  %606 = vbcast.lane.b32.xlu0 %v548_v43, 368 }
 0x3b8   :  { %v555_v44 = vpop.permute.xlu1 %554  ;;  %v551_v45 = vpop.permute.xlu0 %550 }
 0x3b9   :  { %v613_v62 = vadd.f32 %v555_v44, %v865_v21  ;;  %v612_v63 = vadd.f32 %v551_v45, %v859_v18 }
 0x3bc   :  { %v563_v46 = vpop.permute.xlu1 %562  ;;  %v559_v47 = vpop.permute.xlu0 %558 }
 0x3bd   :  { %v615_v2 = vadd.f32 %v563_v46, %v871_v26  ;;  %v614_v3 = vadd.f32 %v559_v47, %v857_v17 }
 0x3c0   :  { %v571_v48 = vpop.permute.xlu1 %570  ;;  %v567_v49 = vpop.permute.xlu0 %566 }
 0x3c1   :  { %v617_v58 = vadd.f32 %v571_v48, %v853_v15  ;;  %v616_v59 = vadd.f32 %v567_v49, %v855_v16 }
 0x3c3   :  { %v629_v8 = vmin.f32 %v613_v62, %v617_v58  ;;  %v628_v9 = vmin.f32 %v612_v63, %v616_v59 }
 0x3c4   :  { %v579_v50 = vpop.permute.xlu1 %578  ;;  %v575_v53 = vpop.permute.xlu0 %574 }
 0x3c5   :  { %v619_v60 = vadd.f32 %v579_v50, %v861_v19  ;;  %v618_v61 = vadd.f32 %v575_v53, %v863_v20 }
 0x3c7   :  { %v631_v12 = vmin.f32 %v615_v2, %v619_v60  ;;  %v630_v13 = vmin.f32 %v614_v3, %v618_v61 }
 0x3c8   :  { %v587_v54 = vpop.permute.xlu1 %586  ;;  %v583_v55 = vpop.permute.xlu0 %582 }
 0x3c9   :  { %v621_v0 = vadd.f32 %v587_v54, %v867_v22  ;;  %v620_v1 = vadd.f32 %v583_v55, %v869_v23 }
 0x3cb   :  { %v633_v14 = vmin.f32 %v629_v8, %v621_v0  ;;  %v632_v24 = vmin.f32 %v628_v9, %v620_v1 }
 0x3cc   :  { %v595_v56 = vpop.permute.xlu1 %594  ;;  %v591_v57 = vpop.permute.xlu0 %590 }
 0x3cd   :  { %v623_v4 = vadd.f32 %v595_v56, %v875_v29  ;;  %v622_v5 = vadd.f32 %v591_v57, %v877_v30 }
 0x3cf   :  { %v635_v25 = vmin.f32 %v631_v12, %v623_v4  ;;  %v634_v27 = vmin.f32 %v630_v13, %v622_v5 }
 0x3d0   :  { %v603_v6 = vpop.permute.xlu1 %602  ;;  %v599_v7 = vpop.permute.xlu0 %598 }
 0x3d1   :  { %v625_v10 = vadd.f32 %v603_v6, %v881_v33  ;;  %v624_v11 = vadd.f32 %v599_v7, %v883_v34 }
 0x3d3   :  { %v637_v32 = vmin.f32 %v633_v14, %v625_v10  ;;  %v636_v35 = vmin.f32 %v632_v24, %v624_v11 }
 0x3d4   :  { %v611_v28 = vpop.permute.xlu1 %610  ;;  %v607_v31 = vpop.permute.xlu0 %606 }
 0x3d5   :  { %v627_v36 = vadd.f32 %v611_v28, %v895_v51  ;;  %v626_v37 = vadd.f32 %v607_v31, %v897_v52  ;;  %v640_v40 = vmin.f32 %v636_v35, %v637_v32 }
 0x3d7   :  { %v639_v38 = vmin.f32 %v635_v25, %v627_v36  ;;  %v638_v39 = vmin.f32 %v634_v27, %v626_v37 }
 0x3d9   :  { %v641_v41 = vmin.f32 %v638_v39, %v639_v38 }
 0x3db   :  { %v642_v42 = vmin.f32 %v640_v40, %v641_v41 }
 0x3dd   :  { %v643_v43 = vrot.slane %v642_v42, 4 }
 0x3df   :  { %v644_v44 = vmin.f32 %v642_v42, %v643_v43 }
 0x3e1   :  { %v645_v45 = vrot.slane %v644_v44, 2 }
 0x3e3   :  { %v646_v46 = vmin.f32 %v644_v44, %v645_v45 }
 0x3e5   :  { %v647_v47 = vrot.slane %v646_v46, 1 }
 0x3e7   :  { %v648_v48 = vmin.f32 %v646_v46, %v647_v47 }
 0x3e9   :  { %654 = vbcast.lane.b32.xlu1 %v648_v48, 264  ;;  %650 = vbcast.lane.b32.xlu0 %v648_v48, 256 }
 0x3ed   :  { %662 = vbcast.lane.b32.xlu1 %v648_v48, 280  ;;  %658 = vbcast.lane.b32.xlu0 %v648_v48, 272 }
 0x3f1   :  { %670 = vbcast.lane.b32.xlu1 %v648_v48, 296  ;;  %666 = vbcast.lane.b32.xlu0 %v648_v48, 288 }
 0x3f5   :  { %678 = vbcast.lane.b32.xlu1 %v648_v48, 312  ;;  %674 = vbcast.lane.b32.xlu0 %v648_v48, 304 }
 0x3f9   :  { %686 = vbcast.lane.b32.xlu1 %v648_v48, 328  ;;  %682 = vbcast.lane.b32.xlu0 %v648_v48, 320 }
 0x3fd   :  { %694 = vbcast.lane.b32.xlu1 %v648_v48, 344  ;;  %690 = vbcast.lane.b32.xlu0 %v648_v48, 336 }
 0x401   :  { %702 = vbcast.lane.b32.xlu1 %v648_v48, 360  ;;  %698 = vbcast.lane.b32.xlu0 %v648_v48, 352 }
 0x405   :  { %710 = vbcast.lane.b32.xlu1 %v648_v48, 376  ;;  %706 = vbcast.lane.b32.xlu0 %v648_v48, 368 }
 0x45b   :  { %v655_v49 = vpop.permute.xlu1 %654  ;;  %v651_v50 = vpop.permute.xlu0 %650 }
 0x45c   :  { %v713_v3 = vadd.f32 %v655_v49, %v865_v21  ;;  %v712_v4 = vadd.f32 %v651_v50, %v859_v18 }
 0x45f   :  { %v663_v53 = vpop.permute.xlu1 %662  ;;  %v659_v54 = vpop.permute.xlu0 %658 }
 0x460   :  { %v715_v7 = vadd.f32 %v663_v53, %v871_v26  ;;  %v714_v8 = vadd.f32 %v659_v54, %v857_v17 }
 0x463   :  { %v671_v55 = vpop.permute.xlu1 %670  ;;  %v667_v56 = vpop.permute.xlu0 %666 }
 0x464   :  { %v717_v63 = vadd.f32 %v671_v55, %v853_v15  ;;  %v716_v0 = vadd.f32 %v667_v56, %v855_v16 }
 0x466   :  { %v729_v10 = vmin.f32 %v713_v3, %v717_v63 }
 0x467   :  { %v679_v57 = vpop.permute.xlu1 %678  ;;  %v675_v58 = vpop.permute.xlu0 %674 }
 0x468   :  { %v719_v1 = vadd.f32 %v679_v57, %v861_v19  ;;  %v718_v2 = vadd.f32 %v675_v58, %v863_v20  ;;  %v728_v20 = vmin.f32 %v712_v4, %v716_v0 }
 0x46a   :  { %v731_v11 = vmin.f32 %v715_v7, %v719_v1 }
 0x46b   :  { %v687_v59 = vpop.permute.xlu1 %686  ;;  %v683_v60 = vpop.permute.xlu0 %682 }
 0x46c   :  { %v721_v5 = vadd.f32 %v687_v59, %v867_v22  ;;  %v720_v6 = vadd.f32 %v683_v60, %v869_v23  ;;  %v730_v22 = vmin.f32 %v714_v8, %v718_v2 }
 0x46e   :  { %v733_v12 = vmin.f32 %v729_v10, %v721_v5  ;;  %v732_v23 = vmin.f32 %v728_v20, %v720_v6 }
 0x46f   :  { %v695_v61 = vpop.permute.xlu1 %694  ;;  %v691_v62 = vpop.permute.xlu0 %690 }
 0x470   :  { %v723_v15 = vadd.f32 %v695_v61, %v875_v29  ;;  %v722_v16 = vadd.f32 %v691_v62, %v877_v30 }
 0x472   :  { %v735_v13 = vmin.f32 %v731_v11, %v723_v15  ;;  %v734_v26 = vmin.f32 %v730_v22, %v722_v16 }
 0x473   :  { %v703_v9 = vpop.permute.xlu1 %702  ;;  %v699_v19 = vpop.permute.xlu0 %698 }
 0x474   :  { %v725_v21 = vadd.f32 %v703_v9, %v881_v33  ;;  %v724_v18 = vadd.f32 %v699_v19, %v883_v34 }
 0x476   :  { %v737_v24 = vmin.f32 %v733_v12, %v725_v21  ;;  %v736_v29 = vmin.f32 %v732_v23, %v724_v18 }
 0x477   :  { %v711_v14 = vpop.permute.xlu1 %710  ;;  %v707_v17 = vpop.permute.xlu0 %706 }
 0x478   :  { %v727_v30 = vadd.f32 %v711_v14, %v895_v51  ;;  %v726_v25 = vadd.f32 %v707_v17, %v897_v52  ;;  %v740_v31 = vmin.f32 %v736_v29, %v737_v24 }
 0x47a   :  { %v739_v27 = vmin.f32 %v735_v13, %v727_v30  ;;  %v738_v28 = vmin.f32 %v734_v26, %v726_v25 }
 0x47c   :  { %v741_v33 = vmin.f32 %v738_v28, %v739_v27 }
 0x47e   :  { %v742_v32 = vmin.f32 %v740_v31, %v741_v33 }
 0x480   :  { %v743_v34 = vrot.slane %v742_v32, 4 }
 0x482   :  { %v744_v35 = vmin.f32 %v742_v32, %v743_v34 }
 0x484   :  { %v745_v36 = vrot.slane %v744_v35, 2 }
 0x486   :  { %v746_v37 = vmin.f32 %v744_v35, %v745_v36 }
 0x488   :  { %v747_v38 = vrot.slane %v746_v37, 1 }
 0x48a   :  { %v748_v39 = vmin.f32 %v746_v37, %v747_v38 }
 0x48c   :  { %749 = vst [vmem:[#allocation6] sm:$0x1] %v748_v39 }
 0x48d   :  { %803 = shalt.err (!%p800_p12)
}
 0x48e   :  { %s804_s29 = scalar_lea.hbm %s1011_s2, 16 }
 0x48f   :  { %p805_p13 = scmp.ne.s32.totalorder %s1011_s2, %s804_s29  ;;  %p808_p0 = scmp.lt.u32.totalorder %s804_s29, %s1011_s2 }
 0x491   :  { %p810_p1 = pnand %p808_p0, %p805_p13 }
 0x493   :  { %813 = shalt.err (!%p810_p1)
}
 0x494   :  { %759 = dma.vmem_to_hbm [thread:$0]  %s757_s1, 16, %s1011_s2, [#allocation5]  }
 0x495   :  { %816 = dma.done.wait [#allocation5], 16  }
 0x496   :  { %817 = vsyncadd [#allocation5], 4294967280 }
 0x497   :  { %763 = vsyncpa [#allocation4], 1 }
 0x498   :  { %764 = vsyncpa [#allocation5], 1 }

</bundles_post_ra>
